<compile_context>
chip_gen: v6e
topology: v6e:2x2x1
jax: 0.10.0
libtpu: 0.0.40
codegen_flags: <defaults>
</compile_context>

<pallas_src>
import functools

import jax
import jax.numpy as jnp
from jax import lax
from jax.experimental import pallas as pl
from jax.experimental.pallas import tpu as pltpu

LANE = 128


def _round_up(v, m):
    return (v + m - 1) // m * m


# --------------------------------------------------------------------------
# Pallas kernel: one curvGN layer (message passing + activation, optional Reg1)
# --------------------------------------------------------------------------
def _curvgn_kernel(*refs, activation, num_valid, compute_reg):
    if compute_reg:
        (x_ref, w_ref, b_ref, m1_ref, m2_ref, mb_ref,
         wmul_ref, ssrc_ref, stgtT_ref, regw_ref, stgtrow_ref,
         out_ref, reg_ref,
         h_sc, num_sc, den_sc, m_sc) = refs
    else:
        (x_ref, w_ref, b_ref, m1_ref, m2_ref, mb_ref,
         wmul_ref, ssrc_ref, stgtT_ref,
         out_ref,
         h_sc, num_sc, den_sc, m_sc) = refs

    f32, bf16 = jnp.float32, jnp.bfloat16
    j = pl.program_id(0)

    @pl.when(j == 0)
    def _init():
        # node linear transform: computed once, kept resident in VMEM scratch
        # (bf16 so the per-tile gather matmul runs at full MXU rate; message
        # accumulation itself stays f32).
        h_sc[...] = (jnp.dot(x_ref[...], w_ref[...], preferred_element_type=f32)
                     + b_ref[...]).astype(bf16)
        num_sc[...] = jnp.zeros_like(num_sc)
        den_sc[...] = jnp.zeros_like(den_sc)
        m_sc[...] = jnp.full_like(m_sc, -1e30)
        if compute_reg:
            reg_ref[...] = jnp.zeros_like(reg_ref)

    # ---- curvature MLP on this edge tile.  [TE,1] x [1,C] is a VPU broadcast
    #      multiply (outer product), not a K=1 MXU matmul.
    a = wmul_ref[...] * m1_ref[...]                        # [TE, C]
    a = jnp.where(a > 0, a, 0.2 * a)                       # LeakyReLU(0.2)
    z = jnp.dot(a, m2_ref[...], preferred_element_type=f32) + mb_ref[...]

    # ---- online per-channel max: a global-per-channel shift leaves the
    #      per-target-node softmax mathematically unchanged but makes exp()
    #      overflow-safe for arbitrary curvature values.
    m_new = jnp.maximum(m_sc[...], jnp.max(z, axis=0, keepdims=True))    # [1, C]
    rescale = jnp.exp(m_sc[...] - m_new)
    num_sc[...] = num_sc[...] * rescale
    den_sc[...] = den_sc[...] * rescale
    m_sc[...] = m_new
    p = jnp.exp(z - m_new)                                 # [TE, C]

    # ---- gather source features / scatter-add into target nodes via one-hot
    #      incidence tiles.  S_tgt arrives pre-transposed ([N, TE]) so both
    #      scatter contractions are plain matmuls (no in-kernel transpose).
    xj = jnp.dot(ssrc_ref[...], h_sc[...], preferred_element_type=f32)   # [TE, C]
    den_sc[...] += jnp.dot(stgtT_ref[...], p.astype(bf16),
                           preferred_element_type=f32)                   # [N, C]
    num_sc[...] += jnp.dot(stgtT_ref[...], (p * xj).astype(bf16),
                           preferred_element_type=f32)                   # [N, C]

    if compute_reg:
        # Fused Reg1 on this layer's *input* features (== conv1's ELU output
        # when this kernel runs as conv2 -- matches the PyTorch module),
        # accumulated over the same edge tiles.
        x_bf = x_ref[...].astype(bf16)
        s = jnp.dot(ssrc_ref[...], x_bf, preferred_element_type=f32)     # [TE, C]
        t = jnp.dot(stgtrow_ref[...], x_bf, preferred_element_type=f32)  # [TE, C]
        d = s - t
        per_edge = jnp.sum(d * d, axis=1, keepdims=True)                 # [TE, 1]
        reg_ref[...] += jnp.sum(per_edge * regw_ref[...], axis=0, keepdims=True)

    @pl.when(j == pl.num_programs(0) - 1)
    def _finalize():
        # reciprocal once per *node* (not per edge), on the EUP slot.
        inv = pl.reciprocal(den_sc[...] + 1e-30, approx=True)
        out = num_sc[...] * inv
        if activation == "elu":                            # F.elu (alpha=1)
            out = jnp.where(out > 0, out, jnp.exp(out) - 1.0)
        elif activation == "log_softmax":                  # over valid lanes only
            col = lax.broadcasted_iota(jnp.int32, out.shape, 1)
            out = jnp.where(col < num_valid, out, -1e30)
            mx = jnp.max(out, axis=1, keepdims=True)
            sh = out - mx
            out = sh - jnp.log(jnp.sum(jnp.exp(sh), axis=1, keepdims=True))
        out_ref[...] = out.astype(out_ref.dtype)


# --------------------------------------------------------------------------
# Python wrappers
# --------------------------------------------------------------------------
def curvgn_layer(x, w, b, m1, m2, mb, w_mul, s_src, s_tgt_t,
                 *, activation, num_valid, reg_w=None, s_tgt_row=None,
                 edge_tile=128):
    n, fin = x.shape
    cp = w.shape[1]
    e_pad = s_src.shape[0]
    assert e_pad % edge_tile == 0 and cp % LANE == 0
    n_et = e_pad // edge_tile
    compute_reg = reg_w is not None

    const = lambda j: (0, 0)
    erow = lambda j: (j, 0)

    in_specs = [
        pl.BlockSpec((n, fin), const),                    # x        (resident)
        pl.BlockSpec((fin, cp), const),                   # W        (resident)
        pl.BlockSpec((1, cp), const),                     # b
        pl.BlockSpec((1, cp), const),                     # M1
        pl.BlockSpec((cp, cp), const),                    # M2
        pl.BlockSpec((1, cp), const),                     # mb
        pl.BlockSpec((edge_tile, 1), erow),               # w_mul    (streamed)
        pl.BlockSpec((edge_tile, n), erow),               # S_src    (streamed)
        pl.BlockSpec((n, edge_tile), lambda j: (0, j)),   # S_tgt^T  (streamed)
    ]
    inputs = [x, w, b, m1, m2, mb, w_mul, s_src, s_tgt_t]
    if compute_reg:
        in_specs += [pl.BlockSpec((edge_tile, 1), erow),  # Reg1 edge weights
                     pl.BlockSpec((edge_tile, n), erow)]  # S_tgt (row-major)
        inputs += [reg_w, s_tgt_row]

    out_shapes = [jax.ShapeDtypeStruct((n, cp), jnp.float32)]
    out_specs = [pl.BlockSpec((n, cp), const)]
    if compute_reg:
        out_shapes.append(jax.ShapeDtypeStruct((1, 1), jnp.float32))
        out_specs.append(pl.BlockSpec((1, 1), const))

    scratch = [pltpu.VMEM((n, cp), jnp.bfloat16),   # h = xW + b (resident)
               pltpu.VMEM((n, cp), jnp.float32),    # numerator accumulator
               pltpu.VMEM((n, cp), jnp.float32),    # denominator accumulator
               pltpu.VMEM((1, cp), jnp.float32)]    # running per-channel max

    kernel = functools.partial(_curvgn_kernel, activation=activation,
                               num_valid=num_valid, compute_reg=compute_reg)
    outs = pl.pallas_call(
        kernel,
        out_shape=tuple(out_shapes),
        grid_spec=pltpu.PrefetchScalarGridSpec(
            num_scalar_prefetch=0,
            grid=(n_et,),
            in_specs=in_specs,
            out_specs=tuple(out_specs),
            scratch_shapes=scratch),
        compiler_params=pltpu.CompilerParams(
            # edge axis is a reduction -> 'arbitrary'.
            # TODO(synk): add a leading 'parallel' node-tile axis at large N so
            #             the scatter/output side shards across v7x's 2 cores.
            dimension_semantics=("arbitrary",),
            vmem_limit_bytes=32 * 1024 * 1024),
    )(*inputs)
    if compute_reg:
        return outs[0], outs[1][0, 0]
    return outs[0]


def net_forward(x_in, edge_src, edge_tgt, e0, w_mul, w_mul_sigmoid, params,
                num_classes, hidden, edge_tile=128):
    """Reproduces Net.forward in eval mode (the two F.dropout(p=0.6) are
    identity).  `num_classes` is passed statically; the PyTorch reference
    derives it as torch.max(data.y) + 1."""
    # TODO(synk): training-mode F.dropout(p=0.6) not reproduced (eval identity).
    n = x_in.shape[0]
    e = edge_src.shape[0]
    e_pad = _round_up(e, edge_tile)
    c1 = _round_up(hidden, LANE)        # lane-dense hidden width   (64  -> 128)
    c2 = _round_up(num_classes, LANE)   # lane-dense class width    (4   -> 128)

    (w1, b1, m1_1, m1_2, m1_b, w2, b2, m2_1, m2_2, m2_b) = params
    pad2 = lambda a, r, c: jnp.pad(a, ((0, r - a.shape[0]), (0, c - a.shape[1])))

    w1p, b1p = pad2(w1, w1.shape[0], c1), pad2(b1, 1, c1)
    m11p, m12p, m1bp = pad2(m1_1, 1, c1), pad2(m1_2, c1, c1), pad2(m1_b, 1, c1)
    w2p, b2p = pad2(w2, c1, c2), pad2(b2, 1, c2)
    m21p, m22p, m2bp = pad2(m2_1, 1, c2), pad2(m2_2, c2, c2), pad2(m2_b, 1, c2)

    # one-hot incidence matrices in bf16 (exact for 0/1); padded "dummy" edges
    # get index -1 -> all-zero rows/columns, i.e. they contribute nothing.
    pad_idx = -jnp.ones((e_pad - e,), jnp.int32)
    src_pad = jnp.concatenate([edge_src.astype(jnp.int32), pad_idx])
    tgt_pad = jnp.concatenate([edge_tgt.astype(jnp.int32), pad_idx])
    s_src = jax.nn.one_hot(src_pad, n, dtype=jnp.bfloat16)     # [Epad, N]
    s_tgt = jax.nn.one_hot(tgt_pad, n, dtype=jnp.bfloat16)     # [Epad, N]
    s_tgt_t = s_tgt.T                                          # [N, Epad] (pre-transposed)
    w_mul_pad = jnp.pad(w_mul, ((0, e_pad - e), (0, 0)))

    # conv1 + fused ELU  (channels hidden..c1-1 of h1 stay exactly zero)
    h1 = curvgn_layer(x_in, w1p, b1p, m11p, m12p, m1bp, w_mul_pad,
                      s_src, s_tgt_t, activation="elu", num_valid=hidden,
                      edge_tile=edge_tile)

    # Reg1 edge weights: mask(src < 20*num_classes) * sigmoid(w_mul), no-loop
    # edges only; zero on self-loop and padded edges.
    edge_mask = (edge_src[:e0] < 20 * num_classes).astype(jnp.float32)
    reg_w = jnp.zeros((e_pad, 1), jnp.float32)
    reg_w = reg_w.at[:e0, 0].set(edge_mask * w_mul_sigmoid)

    # conv2 (+ fused Reg1 on conv2's input == conv1's ELU output) + log_softmax
    logp_pad, reg1 = curvgn_layer(h1, w2p, b2p, m21p, m22p, m2bp, w_mul_pad,
                                  s_src, s_tgt_t, activation="log_softmax",
                                  num_valid=num_classes,
                                  reg_w=reg_w, s_tgt_row=s_tgt,
                                  edge_tile=edge_tile)
    logp = logp_pad[:, :num_classes]
    reg2 = 1
    return logp, reg1, reg2


# --------------------------------------------------------------------------
# Deterministic synthetic data + parameters
# --------------------------------------------------------------------------
if __name__ == "__main__":
    key = jax.random.PRNGKey(0)
    num_nodes, num_feat, num_classes, hidden = 32, 16, 4, 64
    e0 = 224            # no-loop edges; E = e0 + num_nodes = 256 -> two 128-edge tiles

    ks = jax.random.split(key, 16)
    src0 = jax.random.randint(ks[0], (e0,), 0, num_nodes)
    tgt0 = jax.random.randint(ks[1], (e0,), 0, num_nodes)
    loops = jnp.arange(num_nodes)
    edge_src = jnp.concatenate([src0, loops])                 # edge_index[0]
    edge_tgt = jnp.concatenate([tgt0, loops])                 # edge_index[1]
    E = int(edge_src.shape[0])

    x_in = jax.random.normal(ks[2], (num_nodes, num_feat), jnp.float32)
    y = jax.random.randint(ks[3], (num_nodes,), 0, num_classes)   # labels (num_classes
    # is passed statically below; the PyTorch reference computes torch.max(y)+1)
    w_mul = jax.random.normal(ks[4], (E, 1), jnp.float32)     # per-edge curvature scalar
    w_mul_sigmoid = jax.nn.sigmoid(w_mul[:e0, 0])             # per no-loop edge

    def lin(k, fi, fo):
        return jax.random.normal(k, (fi, fo), jnp.float32) / jnp.sqrt(jnp.float32(fi))

    # conv1 = curvGN(num_feat, 64, 64)
    w1 = lin(ks[5], num_feat, hidden)
    b1 = 0.1 * jax.random.normal(ks[6], (1, hidden), jnp.float32)
    m1_1 = lin(ks[7], 1, hidden)                              # Lin(1, 64, bias=False)
    m1_2 = lin(ks[8], hidden, hidden)                         # Lin(64, 64, bias=True)
    m1_b = 0.1 * jax.random.normal(ks[9], (1, hidden), jnp.float32)
    # conv2 = curvGN(64, num_classes, num_classes)
    w2 = lin(ks[10], hidden, num_classes)
    b2 = 0.1 * jax.random.normal(ks[11], (1, num_classes), jnp.float32)
    m2_1 = lin(ks[12], 1, num_classes)
    m2_2 = lin(ks[13], num_classes, num_classes)
    m2_b = 0.1 * jax.random.normal(ks[14], (1, num_classes), jnp.float32)

    params = (w1, b1, m1_1, m1_2, m1_b, w2, b2, m2_1, m2_2, m2_b)

    logp, reg1, reg2 = net_forward(x_in, edge_src, edge_tgt, e0,
                                   w_mul, w_mul_sigmoid, params,
                                   num_classes=num_classes, hidden=hidden)
    jax.block_until_ready((logp, reg1))
    assert logp.shape == (num_nodes, num_classes)
    print("KERNEL_OK")
</pallas_src>

<mosaic_0001>
module attributes {stable_mosaic.version = 11 : i64} {
  func.func @_curvgn_kernel(%arg0: i32, %arg1: memref<32x16xf32, #tpu.memory_space<vmem>>, %arg2: memref<16x128xf32, #tpu.memory_space<vmem>>, %arg3: memref<1x128xf32, #tpu.memory_space<vmem>>, %arg4: memref<1x128xf32, #tpu.memory_space<vmem>>, %arg5: memref<128x128xf32, #tpu.memory_space<vmem>>, %arg6: memref<1x128xf32, #tpu.memory_space<vmem>>, %arg7: memref<128x1xf32, #tpu.memory_space<vmem>>, %arg8: memref<128x32xbf16, #tpu.memory_space<vmem>>, %arg9: memref<32x128xbf16, #tpu.memory_space<vmem>>, %arg10: memref<32x128xf32, #tpu.memory_space<vmem>>, %arg11: memref<32x128xbf16, #tpu.memory_space<vmem>>, %arg12: memref<32x128xf32, #tpu.memory_space<vmem>>, %arg13: memref<32x128xf32, #tpu.memory_space<vmem>>, %arg14: memref<1x128xf32, #tpu.memory_space<vmem>>) attributes {dimension_semantics = [#tpu.dimension_semantics<arbitrary>], iteration_bounds = array<i64: 2>, scalar_prefetch = 0 : i64, scratch_operands = 4 : i64, tpu.core_type = #tpu.core_type<tc>, window_params = [{pipeline_mode = #tpu.pipeline_mode<synchronous>, transform_indices = @transform_0, window_bounds = array<i64: 32, 16>}, {pipeline_mode = #tpu.pipeline_mode<synchronous>, transform_indices = @transform_1, window_bounds = array<i64: 16, 128>}, {pipeline_mode = #tpu.pipeline_mode<synchronous>, transform_indices = @transform_2, window_bounds = array<i64: 1, 128>}, {pipeline_mode = #tpu.pipeline_mode<synchronous>, transform_indices = @transform_3, window_bounds = array<i64: 1, 128>}, {pipeline_mode = #tpu.pipeline_mode<synchronous>, transform_indices = @transform_4, window_bounds = array<i64: 128, 128>}, {pipeline_mode = #tpu.pipeline_mode<synchronous>, transform_indices = @transform_5, window_bounds = array<i64: 1, 128>}, {transform_indices = @transform_6, window_bounds = array<i64: 128, 1>}, {transform_indices = @transform_7, window_bounds = array<i64: 128, 32>}, {transform_indices = @transform_8, window_bounds = array<i64: 32, 128>}, {pipeline_mode = #tpu.pipeline_mode<synchronous>, transform_indices = @transform_9, window_bounds = array<i64: 32, 128>}]} {
    %c0_i32 = arith.constant 0 : i32
    %0 = arith.cmpi eq, %arg0, %c0_i32 : i32
    %1 = arith.extui %0 : i1 to i32
    %c0_i32_0 = arith.constant 0 : i32
    %2 = arith.cmpi ne, %1, %c0_i32_0 : i32
    scf.if %2 {
      %c0_45 = arith.constant 0 : index
      %c0_46 = arith.constant 0 : index
      %56 = vector.load %arg1[%c0_45, %c0_46] : memref<32x16xf32, #tpu.memory_space<vmem>>, vector<32x16xf32>
      %c0_47 = arith.constant 0 : index
      %c0_48 = arith.constant 0 : index
      %57 = vector.load %arg2[%c0_47, %c0_48] : memref<16x128xf32, #tpu.memory_space<vmem>>, vector<16x128xf32>
      %cst_49 = arith.constant dense<0.000000e+00> : vector<32x128xf32>
      %58 = tpu.matmul %56, %57, %cst_49 {dimension_numbers = #tpu.dot_dimension_numbers<[1], [0], [0], [1], [0, 0, 1, 1], [], []>} : vector<32x16xf32>, vector<16x128xf32>, vector<32x128xf32> -> vector<32x128xf32>
      %c0_50 = arith.constant 0 : index
      %c0_51 = arith.constant 0 : index
      %59 = vector.load %arg3[%c0_50, %c0_51] : memref<1x128xf32, #tpu.memory_space<vmem>>, vector<1x128xf32>
      %60 = vector.broadcast %59 : vector<1x128xf32> to vector<32x128xf32>
      %61 = arith.addf %58, %60 : vector<32x128xf32>
      %62 = arith.truncf %61 : vector<32x128xf32> to vector<32x128xbf16>
      %c0_52 = arith.constant 0 : index
      %c0_53 = arith.constant 0 : index
      %63 = vector.load %arg11[%c0_52, %c0_53] : memref<32x128xbf16, #tpu.memory_space<vmem>>, vector<32x128xbf16>
      tpu.vector_store %arg11[%c0_52, %c0_53], %62 {strides = array<i32>} : memref<32x128xbf16, #tpu.memory_space<vmem>>, vector<32x128xbf16>,
      %cst_54 = arith.constant 0.000000e+00 : f32
      %64 = vector.broadcast %cst_54 : f32 to vector<32x128xf32>
      %c0_55 = arith.constant 0 : index
      %c0_56 = arith.constant 0 : index
      %65 = vector.load %arg12[%c0_55, %c0_56] : memref<32x128xf32, #tpu.memory_space<vmem>>, vector<32x128xf32>
      tpu.vector_store %arg12[%c0_55, %c0_56], %64 {strides = array<i32>} : memref<32x128xf32, #tpu.memory_space<vmem>>, vector<32x128xf32>,
      %cst_57 = arith.constant 0.000000e+00 : f32
      %66 = vector.broadcast %cst_57 : f32 to vector<32x128xf32>
      %c0_58 = arith.constant 0 : index
      %c0_59 = arith.constant 0 : index
      %67 = vector.load %arg13[%c0_58, %c0_59] : memref<32x128xf32, #tpu.memory_space<vmem>>, vector<32x128xf32>
      tpu.vector_store %arg13[%c0_58, %c0_59], %66 {strides = array<i32>} : memref<32x128xf32, #tpu.memory_space<vmem>>, vector<32x128xf32>,
      %cst_60 = arith.constant -1.000000e+30 : f32
      %68 = vector.broadcast %cst_60 : f32 to vector<1x128xf32>
      %c0_61 = arith.constant 0 : index
      %c0_62 = arith.constant 0 : index
      %69 = vector.load %arg14[%c0_61, %c0_62] : memref<1x128xf32, #tpu.memory_space<vmem>>, vector<1x128xf32>
      tpu.vector_store %arg14[%c0_61, %c0_62], %68 {strides = array<i32>} : memref<1x128xf32, #tpu.memory_space<vmem>>, vector<1x128xf32>,
    } else {
    }
    %c0 = arith.constant 0 : index
    %c0_1 = arith.constant 0 : index
    %3 = vector.load %arg7[%c0, %c0_1] : memref<128x1xf32, #tpu.memory_space<vmem>>, vector<128x1xf32>
    %c0_2 = arith.constant 0 : index
    %c0_3 = arith.constant 0 : index
    %4 = vector.load %arg4[%c0_2, %c0_3] : memref<1x128xf32, #tpu.memory_space<vmem>>, vector<1x128xf32>
    %5 = vector.broadcast %3 : vector<128x1xf32> to vector<128x128xf32>
    %6 = vector.broadcast %4 : vector<1x128xf32> to vector<128x128xf32>
    %7 = arith.mulf %5, %6 : vector<128x128xf32>
    %cst = arith.constant 0.000000e+00 : f32
    %8 = vector.broadcast %cst : f32 to vector<128x128xf32>
    %9 = arith.cmpf ogt, %7, %8 : vector<128x128xf32>
    %cst_4 = arith.constant 2.000000e-01 : f32
    %10 = vector.broadcast %cst_4 : f32 to vector<128x128xf32>
    %11 = arith.mulf %10, %7 : vector<128x128xf32>
    %12 = arith.select %9, %7, %11 : vector<128x128xi1>, vector<128x128xf32>
    %c0_5 = arith.constant 0 : index
    %c0_6 = arith.constant 0 : index
    %13 = vector.load %arg5[%c0_5, %c0_6] : memref<128x128xf32, #tpu.memory_space<vmem>>, vector<128x128xf32>
    %cst_7 = arith.constant dense<0.000000e+00> : vector<128x128xf32>
    %14 = tpu.matmul %12, %13, %cst_7 {dimension_numbers = #tpu.dot_dimension_numbers<[1], [0], [0], [1], [0, 0, 1, 1], [], []>} : vector<128x128xf32>, vector<128x128xf32>, vector<128x128xf32> -> vector<128x128xf32>
    %c0_8 = arith.constant 0 : index
    %c0_9 = arith.constant 0 : index
    %15 = vector.load %arg6[%c0_8, %c0_9] : memref<1x128xf32, #tpu.memory_space<vmem>>, vector<1x128xf32>
    %16 = vector.broadcast %15 : vector<1x128xf32> to vector<128x128xf32>
    %17 = arith.addf %14, %16 : vector<128x128xf32>
    %c0_10 = arith.constant 0 : index
    %c0_11 = arith.constant 0 : index
    %18 = vector.load %arg14[%c0_10, %c0_11] : memref<1x128xf32, #tpu.memory_space<vmem>>, vector<1x128xf32>
    %cst_12 = arith.constant dense<0xFF800000> : vector<128xf32>
    %19 = vector.multi_reduction <maximumf>, %17, %cst_12 [0] : vector<128x128xf32> to vector<128xf32>
    %20 = vector.shape_cast %19 : vector<128xf32> to vector<1x128xf32>
    %21 = arith.maximumf %18, %20 : vector<1x128xf32>
    %c0_13 = arith.constant 0 : index
    %c0_14 = arith.constant 0 : index
    %22 = vector.load %arg14[%c0_13, %c0_14] : memref<1x128xf32, #tpu.memory_space<vmem>>, vector<1x128xf32>
    %23 = arith.subf %22, %21 : vector<1x128xf32>
    %24 = math.exp %23 : vector<1x128xf32>
    %c0_15 = arith.constant 0 : index
    %c0_16 = arith.constant 0 : index
    %25 = vector.load %arg12[%c0_15, %c0_16] : memref<32x128xf32, #tpu.memory_space<vmem>>, vector<32x128xf32>
    %26 = vector.broadcast %24 : vector<1x128xf32> to vector<32x128xf32>
    %27 = arith.mulf %25, %26 : vector<32x128xf32>
    %c0_17 = arith.constant 0 : index
    %c0_18 = arith.constant 0 : index
    %28 = vector.load %arg12[%c0_17, %c0_18] : memref<32x128xf32, #tpu.memory_space<vmem>>, vector<32x128xf32>
    tpu.vector_store %arg12[%c0_17, %c0_18], %27 {strides = array<i32>} : memref<32x128xf32, #tpu.memory_space<vmem>>, vector<32x128xf32>,
    %c0_19 = arith.constant 0 : index
    %c0_20 = arith.constant 0 : index
    %29 = vector.load %arg13[%c0_19, %c0_20] : memref<32x128xf32, #tpu.memory_space<vmem>>, vector<32x128xf32>
    %30 = vector.broadcast %24 : vector<1x128xf32> to vector<32x128xf32>
    %31 = arith.mulf %29, %30 : vector<32x128xf32>
    %c0_21 = arith.constant 0 : index
    %c0_22 = arith.constant 0 : index
    %32 = vector.load %arg13[%c0_21, %c0_22] : memref<32x128xf32, #tpu.memory_space<vmem>>, vector<32x128xf32>
    tpu.vector_store %arg13[%c0_21, %c0_22], %31 {strides = array<i32>} : memref<32x128xf32, #tpu.memory_space<vmem>>, vector<32x128xf32>,
    %c0_23 = arith.constant 0 : index
    %c0_24 = arith.constant 0 : index
    %33 = vector.load %arg14[%c0_23, %c0_24] : memref<1x128xf32, #tpu.memory_space<vmem>>, vector<1x128xf32>
    tpu.vector_store %arg14[%c0_23, %c0_24], %21 {strides = array<i32>} : memref<1x128xf32, #tpu.memory_space<vmem>>, vector<1x128xf32>,
    %34 = vector.broadcast %21 : vector<1x128xf32> to vector<128x128xf32>
    %35 = arith.subf %17, %34 : vector<128x128xf32>
    %36 = math.exp %35 : vector<128x128xf32>
    %c0_25 = arith.constant 0 : index
    %c0_26 = arith.constant 0 : index
    %37 = vector.load %arg8[%c0_25, %c0_26] : memref<128x32xbf16, #tpu.memory_space<vmem>>, vector<128x32xbf16>
    %c0_27 = arith.constant 0 : index
    %c0_28 = arith.constant 0 : index
    %38 = vector.load %arg11[%c0_27, %c0_28] : memref<32x128xbf16, #tpu.memory_space<vmem>>, vector<32x128xbf16>
    %cst_29 = arith.constant dense<0.000000e+00> : vector<128x128xf32>
    %39 = tpu.matmul %37, %38, %cst_29 {dimension_numbers = #tpu.dot_dimension_numbers<[1], [0], [0], [1], [0, 0, 1, 1], [], []>} : vector<128x32xbf16>, vector<32x128xbf16>, vector<128x128xf32> -> vector<128x128xf32>
    %c0_30 = arith.constant 0 : index
    %c0_31 = arith.constant 0 : index
    %40 = vector.load %arg13[%c0_30, %c0_31] : memref<32x128xf32, #tpu.memory_space<vmem>>, vector<32x128xf32>
    %c0_32 = arith.constant 0 : index
    %c0_33 = arith.constant 0 : index
    %41 = vector.load %arg9[%c0_32, %c0_33] : memref<32x128xbf16, #tpu.memory_space<vmem>>, vector<32x128xbf16>
    %42 = arith.truncf %36 : vector<128x128xf32> to vector<128x128xbf16>
    %cst_34 = arith.constant dense<0.000000e+00> : vector<32x128xf32>
    %43 = tpu.matmul %41, %42, %cst_34 {dimension_numbers = #tpu.dot_dimension_numbers<[1], [0], [0], [1], [0, 0, 1, 1], [], []>} : vector<32x128xbf16>, vector<128x128xbf16>, vector<32x128xf32> -> vector<32x128xf32>
    %44 = arith.addf %40, %43 : vector<32x128xf32>
    %c0_35 = arith.constant 0 : index
    %c0_36 = arith.constant 0 : index
    %45 = vector.load %arg13[%c0_35, %c0_36] : memref<32x128xf32, #tpu.memory_space<vmem>>, vector<32x128xf32>
    tpu.vector_store %arg13[%c0_35, %c0_36], %44 {strides = array<i32>} : memref<32x128xf32, #tpu.memory_space<vmem>>, vector<32x128xf32>,
    %c0_37 = arith.constant 0 : index
    %c0_38 = arith.constant 0 : index
    %46 = vector.load %arg12[%c0_37, %c0_38] : memref<32x128xf32, #tpu.memory_space<vmem>>, vector<32x128xf32>
    %c0_39 = arith.constant 0 : index
    %c0_40 = arith.constant 0 : index
    %47 = vector.load %arg9[%c0_39, %c0_40] : memref<32x128xbf16, #tpu.memory_space<vmem>>, vector<32x128xbf16>
    %48 = arith.mulf %36, %39 : vector<128x128xf32>
    %49 = arith.truncf %48 : vector<128x128xf32> to vector<128x128xbf16>
    %cst_41 = arith.constant dense<0.000000e+00> : vector<32x128xf32>
    %50 = tpu.matmul %47, %49, %cst_41 {dimension_numbers = #tpu.dot_dimension_numbers<[1], [0], [0], [1], [0, 0, 1, 1], [], []>} : vector<32x128xbf16>, vector<128x128xbf16>, vector<32x128xf32> -> vector<32x128xf32>
    %51 = arith.addf %46, %50 : vector<32x128xf32>
    %c0_42 = arith.constant 0 : index
    %c0_43 = arith.constant 0 : index
    %52 = vector.load %arg12[%c0_42, %c0_43] : memref<32x128xf32, #tpu.memory_space<vmem>>, vector<32x128xf32>
    tpu.vector_store %arg12[%c0_42, %c0_43], %51 {strides = array<i32>} : memref<32x128xf32, #tpu.memory_space<vmem>>, vector<32x128xf32>,
    %c1_i32 = arith.constant 1 : i32
    %53 = arith.cmpi eq, %arg0, %c1_i32 : i32
    %54 = arith.extui %53 : i1 to i32
    %c0_i32_44 = arith.constant 0 : i32
    %55 = arith.cmpi ne, %54, %c0_i32_44 : i32
    scf.if %55 {
      %c0_45 = arith.constant 0 : index
      %c0_46 = arith.constant 0 : index
      %56 = vector.load %arg13[%c0_45, %c0_46] : memref<32x128xf32, #tpu.memory_space<vmem>>, vector<32x128xf32>
      %cst_47 = arith.constant 1.000000e-30 : f32
      %57 = vector.broadcast %cst_47 : f32 to vector<32x128xf32>
      %58 = arith.addf %56, %57 : vector<32x128xf32>
      %59 = tpu.reciprocal %58 {approx = true} : vector<32x128xf32> -> vector<32x128xf32>
      %c0_48 = arith.constant 0 : index
      %c0_49 = arith.constant 0 : index
      %60 = vector.load %arg12[%c0_48, %c0_49] : memref<32x128xf32, #tpu.memory_space<vmem>>, vector<32x128xf32>
      %61 = arith.mulf %60, %59 : vector<32x128xf32>
      %cst_50 = arith.constant 0.000000e+00 : f32
      %62 = vector.broadcast %cst_50 : f32 to vector<32x128xf32>
      %63 = arith.cmpf ogt, %61, %62 : vector<32x128xf32>
      %64 = math.exp %61 : vector<32x128xf32>
      %cst_51 = arith.constant 1.000000e+00 : f32
      %65 = vector.broadcast %cst_51 : f32 to vector<32x128xf32>
      %66 = arith.subf %64, %65 : vector<32x128xf32>
      %67 = arith.select %63, %61, %66 : vector<32x128xi1>, vector<32x128xf32>
      %c0_52 = arith.constant 0 : index
      %c0_53 = arith.constant 0 : index
      %68 = vector.load %arg10[%c0_52, %c0_53] : memref<32x128xf32, #tpu.memory_space<vmem>>, vector<32x128xf32>
      tpu.vector_store %arg10[%c0_52, %c0_53], %67 {strides = array<i32>} : memref<32x128xf32, #tpu.memory_space<vmem>>, vector<32x128xf32>,
    } else {
    }
    return
  }
  func.func @transform_0(%arg0: i32) -> (i32, i32) {
    %c0_i32 = arith.constant 0 : i32
    %c0_i32_0 = arith.constant 0 : i32
    %c0_i32_1 = arith.constant 0 : i32
    return %c0_i32, %c0_i32_0 : i32, i32
  }
  func.func @transform_1(%arg0: i32) -> (i32, i32) {
    %c0_i32 = arith.constant 0 : i32
    %c0_i32_0 = arith.constant 0 : i32
    %c0_i32_1 = arith.constant 0 : i32
    return %c0_i32, %c0_i32_0 : i32, i32
  }
  func.func @transform_2(%arg0: i32) -> (i32, i32) {
    %c0_i32 = arith.constant 0 : i32
    %c0_i32_0 = arith.constant 0 : i32
    %c0_i32_1 = arith.constant 0 : i32
    return %c0_i32, %c0_i32_0 : i32, i32
  }
  func.func @transform_3(%arg0: i32) -> (i32, i32) {
    %c0_i32 = arith.constant 0 : i32
    %c0_i32_0 = arith.constant 0 : i32
    %c0_i32_1 = arith.constant 0 : i32
    return %c0_i32, %c0_i32_0 : i32, i32
  }
  func.func @transform_4(%arg0: i32) -> (i32, i32) {
    %c0_i32 = arith.constant 0 : i32
    %c0_i32_0 = arith.constant 0 : i32
    %c0_i32_1 = arith.constant 0 : i32
    return %c0_i32, %c0_i32_0 : i32, i32
  }
  func.func @transform_5(%arg0: i32) -> (i32, i32) {
    %c0_i32 = arith.constant 0 : i32
    %c0_i32_0 = arith.constant 0 : i32
    %c0_i32_1 = arith.constant 0 : i32
    return %c0_i32, %c0_i32_0 : i32, i32
  }
  func.func @transform_6(%arg0: i32) -> (i32, i32) {
    %c0_i32 = arith.constant 0 : i32
    %c0_i32_0 = arith.constant 0 : i32
    return %arg0, %c0_i32 : i32, i32
  }
  func.func @transform_7(%arg0: i32) -> (i32, i32) {
    %c0_i32 = arith.constant 0 : i32
    %c0_i32_0 = arith.constant 0 : i32
    return %arg0, %c0_i32 : i32, i32
  }
  func.func @transform_8(%arg0: i32) -> (i32, i32) {
    %c0_i32 = arith.constant 0 : i32
    %c0_i32_0 = arith.constant 0 : i32
    return %c0_i32, %arg0 : i32, i32
  }
  func.func @transform_9(%arg0: i32) -> (i32, i32) {
    %c0_i32 = arith.constant 0 : i32
    %c0_i32_0 = arith.constant 0 : i32
    %c0_i32_1 = arith.constant 0 : i32
    return %c0_i32, %c0_i32_0 : i32, i32
  }
}

</mosaic_0001>

<bundles_post_ra>
// kernel: tpu_custom_call.1
= control target key start
LH: loop header
LB: loop body
LE: loop exit
PB: predicated region body
PF: predicated region fallthrough
CT: control target
= control target key end

     0   :  { %14 = vsyncpa [#allocation8], 0  ;;  %s1992_s30 = smov 0   ;;  %s1994_s10 = smov 0   ;;  %s2302_s0 = inlined_call_operand.vmem [shape: f32[32,16], index: 0, kind: input, shape index: {}]   ;;  %s2303_s1 = inlined_call_operand.vmem [shape: f32[16,128], index: 1, kind: input, shape index: {}]   ;;  %s2304_s2 = inlined_call_operand.vmem [shape: f32[1,128], index: 2, kind: input, shape index: {}]   ;;  %s2305_s3 = inlined_call_operand.vmem [shape: f32[1,128], index: 3, kind: input, shape index: {}]   ;;  %s2306_s4 = inlined_call_operand.vmem [shape: f32[128,128], index: 4, kind: input, shape index: {}]   ;;  %s2307_s5 = inlined_call_operand.vmem [shape: f32[1,128], index: 5, kind: input, shape index: {}]   ;;  %s2308_s6 = inlined_call_operand.vmem [shape: f32[256,1], index: 6, kind: input, shape index: {}]   ;;  %s2309_s7 = inlined_call_operand.vmem [shape: bf16[256,32], index: 7, kind: input, shape index: {}]   ;;  %s2310_s8 = inlined_call_operand.vmem [shape: bf16[32,256], index: 8, kind: input, shape index: {}]   ;;  %s2311_s9 = inlined_call_operand.hbm [shape: f32[32,128], index: 9, kind: output, shape index: {}]  }
   0x1   :  { %s1996_s11 = smov 0  }
   0x2 LB: > { %s2008_s12 = sadd.s32 4294967295, %s1934_s11   ;;  %s2011_s13 = sadd.s32 1, %s1934_s11   ;;  %s1934_s11 = sphi %s1996_s11, %s2314_s11   ;;  %s1930_s10 = sphi %s1994_s10, %s2313_s10   ;;  %s1926_s30 = sphi %s1992_s30, %s2312_s30  }
   0x3   : > { %s202_s14 = ssub.s32 %s1934_s11, %s2011_s13  ;;  %s205_s15 = sadd.s32 1, %s1930_s10 }
   0x4   : > { %p203_p0 = scmp.eq.s32.totalorder %s202_s14, 0  ;;  %p212_p1 = scmp.ne.s32.totalorder %s1930_s10, %s1926_s30 }
   0x5   : > { %p213_p2 = scmp.eq.s32.totalorder %s1934_s11, 0  ;;  %p1517_p4 = scmp.ge.s32.totalorder %s1934_s11, 2 }
   0x6   : > { %s2020_s16 = scalar_select %p203_p0, %s1930_s10, %s205_s15  }
   0x7   : > { %p214_p3 = por %p213_p2, %p212_p1  ;;  %277 = sbr.rel (%p1517_p4) target bundleno = 18 (0x12), region = 40 }
   0xc   : > { %298 = sbr.rel (!%p214_p3) target bundleno = 18 (0x12), region = 52  ;;  %s300_s17 = sand.u32 (%p214_p3), 1, %s1930_s10  }
   0xd   : > { %s1519_s18 = sshll.u32 (%p214_p3), %s1934_s11, 2  ;;  %s1518_s19 = sshll.u32 (%p214_p3), %s300_s17, 4 }
   0xe   : > { %s304_s22 = scalar_lea.vmem (%p214_p3), %s2310_s8, %s1519_s18  ;;  %s302_s23 = scalar_lea.vmem (%p214_p3), [#allocation6], %s1518_s19 }
   0xf   : > { %v321_v0 = vld [vmem:[%s304_s22] sm:$0xf] (%p214_p3)  ;;  %v323_v1 = vld [vmem:[%s304_s22 + $0x8] sm:$0xf] (%p214_p3)  ;;  %v325_v2 = vld [vmem:[%s304_s22 + $0x10] sm:$0xf] (%p214_p3) }
  0x10   : > { %322 = vst [vmem:[%s302_s23] sm:$0xf] (%p214_p3), %v321_v0  ;;  %324 = vst [vmem:[%s302_s23 + $0x4] sm:$0xf] (%p214_p3), %v323_v1  ;;  %v327_v3 = vld [vmem:[%s304_s22 + $0x18] sm:$0xf] (%p214_p3) }
  0x11   : > { %326 = vst [vmem:[%s302_s23 + $0x8] sm:$0xf] %v325_v2  ;;  %328 = vst [vmem:[%s302_s23 + $0xc] sm:$0xf] %v327_v3 }
  0x12 PF: > { %p1520_p5 = scmp.ge.s32.totalorder %s1934_s11, 1  ;;  %p359_p6 = scmp.lt.s32.totalorder %s1934_s11, 3 }
  0x14   : > { %p360_p7 = pnand %p1520_p5, %p359_p6 }
  0x15   : > { %s366_s24 = sand.u32 (!%p360_p7), 1, %s1926_s30   ;;  %s1522_s25 = sshll.u32 (!%p360_p7), %s2008_s12, 4 }
  0x16   : > { %363 = sbr.rel (%p360_p7) target bundleno = 942 (0x3ae), region = 93  ;;  %s1521_s26 = sshll.u32 (!%p360_p7), %s366_s24, 4 }
  0x17   : > { %p407_p8 = scmp.lt.s32.totalorder (!%p360_p7), %s1522_s25, 31  ;;  %s2042_s19 = scalar_lea.vmem (!%p360_p7), [#allocation6], %s1521_s26 }
  0x18   : > { %p1526_p9 = scmp.ne.s32.totalorder (!%p360_p7), %s2008_s12, 0 }
  0x1b   : > { %s2316_s25 = smov (!%p407_p8, %s1522_s25), 31  ;;  %422 = sbr.rel (%p1526_p9) target bundleno = 238 (0xee), region = 101 }
  0x1c   : > { %s1523_s27 = sshll.u32 %s2316_s25, 3  ;;  %s1525_s28 = sshll.u32 %s2316_s25, 2 }
  0x1d   : > { %s2035_s15 = scalar_lea.vmem %s2308_s6, %s1523_s27  ;;  %s2040_s11 = scalar_lea.vmem %s2309_s7, %s1525_s28 }
  0x20   : > { %v428_v4 = vld [vmem:[%s2303_s1 + $0x8] sm:$0xff]  ;;  %v427_v5 = vld [vmem:[%s2303_s1] sm:$0xff]  ;;  %vm436_vm0 = vcmask 130048   ;;  %v425_v7 = vld [vmem:[%s2302_s0 + $0x10] sm:$0xff]  ;;  %v1936_v10 = vmov 0.0  }
  0x21   : > { %1652 = vmatprep.subr.mxu0 %v428_v4  ;;  %1778 = vmatprep.subr.mxu1 %v428_v4  ;;  %v423_v6 = vld [vmem:[%s2302_s0] sm:$0xff]  ;;  %v424_v8 = vld [vmem:[%s2302_s0 + $0x8] sm:$0xff]  ;;  %v426_v9 = vld [vmem:[%s2302_s0 + $0x18] sm:$0xff]  ;;  %554 = vst [vmem:[#allocation3 + $0x10] sm:$0xff] %v1936_v10  ;;  %v1937_v11 = vmov -1e+30  }
  0x22   : > { %1653 = vmatpush3.msra.mxu0 %v428_v4  ;;  %1780 = vmatpush3.msra.mxu1 %v428_v4  ;;  %555 = vst [vmem:[#allocation3] sm:$0xff] %v1936_v10  ;;  %556 = vst [vmem:[#allocation3 + $0x18] sm:$0xff] %v1936_v10  ;;  %v1527_v13 = vld [vmem:[%s2304_s2] ss:$0 sm:$0xff] }
  0x23   : > { %1654 = vmatprep.subr.mxu0 %v427_v5  ;;  %1779 = vmatprep.subr.mxu1 %v427_v5  ;;  %557 = vst [vmem:[#allocation3 + $0x8] sm:$0xff] %v1936_v10  ;;  %558 = vst [vmem:[#allocation4] sm:$0xff] %v1936_v10 }
  0x24   : > { %1655 = vmatpush3.msra.mxu0 %v427_v5  ;;  %1781 = vmatpush3.msra.mxu1 %v427_v5  ;;  %559 = vst [vmem:[#allocation4 + $0x18] sm:$0xff] %v1936_v10  ;;  %560 = vst [vmem:[#allocation4 + $0x8] sm:$0xff] %v1936_v10 }
  0x25   : > { %1656 = vmatprep.mubr.msk.f32.mxu0 %vm436_vm0, %v423_v6  ;;  %1659 = vmatprep.mubr.msk.f32.mxu1 %vm436_vm0, %v425_v7  ;;  %561 = vst [vmem:[#allocation4 + $0x10] sm:$0xff] %v1936_v10  ;;  %562 = vst [vmem:[#allocation5] sm:$0x1] %v1937_v11 }
  0x26   : > { %1657 = vmatmul.mubr.msk.f32.vlgmr.msra.gmra.mxu0 %vm436_vm0, %v424_v8  ;;  %1660 = vmatmul.mubr.msk.f32.vlgmr.msra.gmra.mxu1 %vm436_vm0, %v426_v9 }
  0xe6   : > { %v1658_v12 = vpop.f32.mrf.mxu0  ;;  %v1661_v14 = vpop.f32.mrf.mxu1 }
  0xe7   : > { %v521_v17 = vadd.f32 %v1658_v12, %v1527_v13  ;;  %v531_v18 = vadd.f32 %v1661_v14, %v1527_v13 }
  0xe8   : > { %v515_v15 = vpop.f32.mrf.mxu0  ;;  %v525_v16 = vpop.f32.mrf.mxu1 }
  0xe9   : > { %v516_v19 = vadd.f32 %v1527_v13, %v515_v15  ;;  %v526_v20 = vadd.f32 %v1527_v13, %v525_v16 }
  0xeb   : > { %v1576_v21 = vpack.c.bf16 %v521_v17, %v516_v19  ;;  %v1581_v22 = vpack.c.bf16 %v531_v18, %v526_v20 }
  0xed   : > { %1577 = vst [vmem:[#allocation2] sm:$0xff] %v1576_v21   ;;  %1583 = vst [vmem:[#allocation2 + $0x8] sm:$0xff] %v1581_v22  }
  0xee PF: > { %v565_v23 = vld [vmem:[%s2035_s15 + $0x10] sm:$0xff]  ;;  %v563_v24 = vld [vmem:[%s2035_s15] sm:$0xff]  ;;  %v1938_v25 = vmov 0   ;;  %v566_v26 = vld [vmem:[%s2035_s15 + $0x18] sm:$0xff]  ;;  %vm1081_vm1 = vcmask 261120   ;;  %p1560_p10 = scmp.ne.s32.totalorder %s2008_s12, 1 }
  0xef   : > { %1819 = vset.pattern.permute.xlu1 %v1938_v25  ;;  %1818 = vset.pattern.permute.xlu0 %v1938_v25  ;;  %v564_v27 = vld [vmem:[%s2035_s15 + $0x8] sm:$0xff]  ;;  %v745_v28 = vld [vmem:[%s2306_s4 + $0x78] sm:$0xff]  ;;  %v744_v29 = vld [vmem:[%s2306_s4 + $0x70] sm:$0xff] }
  0xf0   : > { %592 = vperm.xlu1 %1819, %v565_v23   ;;  %582 = vperm.xlu0 %1818, %v563_v24   ;;  %v568_v30 = vld [vmem:[%s2035_s15 + $0x28] sm:$0xff]  ;;  %v567_v31 = vld [vmem:[%s2035_s15 + $0x20] sm:$0xff]  ;;  %v570_v33 = vld [vmem:[%s2035_s15 + $0x38] sm:$0xff] }
  0xf1   : > { %1662 = vmatprep.subr.mxu0 %v745_v28  ;;  %v743_v32 = vld [vmem:[%s2306_s4 + $0x68] sm:$0xff]  ;;  %v569_v34 = vld [vmem:[%s2035_s15 + $0x30] sm:$0xff]  ;;  %v742_v35 = vld [vmem:[%s2306_s4 + $0x60] sm:$0xff] }
  0xf2   : > { %1663 = vmatpush3.msra.mxu0 %v745_v28  ;;  %v741_v36 = vld [vmem:[%s2306_s4 + $0x58] sm:$0xff]  ;;  %v572_v37 = vld [vmem:[%s2035_s15 + $0x48] sm:$0xff]  ;;  %v571_v38 = vld [vmem:[%s2035_s15 + $0x40] sm:$0xff] }
  0xf3   : > { %1664 = vmatprep.subr.mxu0 %v744_v29  ;;  %v740_v39 = vld [vmem:[%s2306_s4 + $0x50] sm:$0xff]  ;;  %v574_v40 = vld [vmem:[%s2035_s15 + $0x58] sm:$0xff]  ;;  %v739_v42 = vld [vmem:[%s2306_s4 + $0x48] sm:$0xff] }
  0xf4   : > { %597 = vperm.xlu1 %1819, %v566_v26   ;;  %587 = vperm.xlu0 %1818, %v564_v27   ;;  %v573_v41 = vld [vmem:[%s2035_s15 + $0x50] sm:$0xff]  ;;  %v738_v43 = vld [vmem:[%s2306_s4 + $0x40] sm:$0xff]  ;;  %v576_v44 = vld [vmem:[%s2035_s15 + $0x68] sm:$0xff] }
  0xf5   : > { %1665 = vmatpush3.msra.mxu0 %v744_v29  ;;  %v575_v45 = vld [vmem:[%s2035_s15 + $0x60] sm:$0xff]  ;;  %v737_v46 = vld [vmem:[%s2306_s4 + $0x38] sm:$0xff]  ;;  %v577_v48 = vld [vmem:[%s2035_s15 + $0x70] sm:$0xff] }
  0xf6   : > { %1666 = vmatprep.subr.mxu0 %v743_v32  ;;  %v578_v47 = vld [vmem:[%s2035_s15 + $0x78] sm:$0xff]  ;;  %v736_v49 = vld [vmem:[%s2306_s4 + $0x30] sm:$0xff]  ;;  %v735_v50 = vld [vmem:[%s2306_s4 + $0x28] sm:$0xff] }
  0xf7   : > { %1667 = vmatpush3.msra.mxu0 %v743_v32  ;;  %v734_v51 = vld [vmem:[%s2306_s4 + $0x20] sm:$0xff]  ;;  %v733_v52 = vld [vmem:[%s2306_s4 + $0x18] sm:$0xff]  ;;  %v1820_v53 = vld [vmem:[#allocation2 + $0x8] sm:$0xff]  }
  0xf8   : > { %607 = vperm.xlu1 %1819, %v568_v30   ;;  %602 = vperm.xlu0 %1818, %v567_v31   ;;  %v1821_v54 = vld [vmem:[#allocation2] sm:$0xff]   ;;  %v732_v55 = vld [vmem:[%s2306_s4 + $0x10] sm:$0xff]  ;;  %v731_v57 = vld [vmem:[%s2306_s4 + $0x8] sm:$0xff] }
  0xf9   : > { %1668 = vmatprep.subr.mxu0 %v742_v35  ;;  %v1822_v56 = vld [vmem:[%s2040_s11] sm:$0xff]   ;;  %1718 = vmatprep.subr.bf16.mxu1 %v1820_v53  ;;  %v1823_v59 = vld [vmem:[%s2040_s11 + $0x8] sm:$0xff]   ;;  %v1824_v60 = vld [vmem:[%s2040_s11 + $0x10] sm:$0xff]  }
  0xfa   : > { %1669 = vmatpush3.msra.mxu0 %v742_v35  ;;  %1719 = vmatpush3.bf16.msra.mxu1 %v1820_v53  ;;  %v730_v58 = vld [vmem:[%s2306_s4] sm:$0xff]  ;;  %v1825_v61 = vld [vmem:[%s2040_s11 + $0x18] sm:$0xff]   ;;  %v1827_v63 = vld [vmem:[%s2040_s11 + $0x28] sm:$0xff]  }
  0xfb   : > { %1670 = vmatprep.subr.mxu0 %v741_v36  ;;  %1720 = vmatprep.subr.bf16.mxu1 %v1821_v54  ;;  %v1826_v62 = vld [vmem:[%s2040_s11 + $0x20] sm:$0xff]   ;;  %v1828_v0 = vld [vmem:[%s2040_s11 + $0x30] sm:$0xff]   ;;  %v1829_v1 = vld [vmem:[%s2040_s11 + $0x38] sm:$0xff]  }
  0xfc   : > { %617 = vperm.xlu1 %1819, %v570_v33   ;;  %612 = vperm.xlu0 %1818, %v569_v34   ;;  %v2149_v2 = vld [vmem:[%s2305_s3] ss:$0 sm:$0xff] }
  0xfd   : > { %1671 = vmatpush3.msra.mxu0 %v741_v36  ;;  %1722 = vmatprep.mubr.msk.bf16.mxu1 %vm1081_vm1, %v1822_v56 }
  0xfe   : > { %1672 = vmatprep.subr.mxu0 %v740_v39  ;;  %1721 = vmatpush3.bf16.msra.mxu1 %v1821_v54 }
  0xff   : > { %1673 = vmatpush3.msra.mxu0 %v740_v39 }
 0x100   : > { %627 = vperm.xlu1 %1819, %v572_v37   ;;  %622 = vperm.xlu0 %1818, %v571_v38  }
 0x101   : > { %1674 = vmatprep.subr.mxu0 %v739_v42  ;;  %1723 = vmatmul.mubr.msk.bf16.vlgmr.msra.gmra.mxu1 %vm1081_vm1, %v1823_v59 }
 0x102   : > { %1675 = vmatpush3.msra.mxu0 %v739_v42  ;;  %1726 = vmatprep.mubr.msk.bf16.mxu1 %vm1081_vm1, %v1824_v60 }
 0x103   : > { %1676 = vmatprep.subr.mxu0 %v738_v43 }
 0x104   : > { %637 = vperm.xlu1 %1819, %v574_v40   ;;  %632 = vperm.xlu0 %1818, %v573_v41  }
 0x105   : > { %1677 = vmatpush3.msra.mxu0 %v738_v43 }
 0x106   : > { %1678 = vmatprep.subr.mxu0 %v737_v46 }
 0x107   : > { %1679 = vmatpush3.msra.mxu0 %v737_v46 }
 0x108   : > { %647 = vperm.xlu1 %1819, %v576_v44   ;;  %642 = vperm.xlu0 %1818, %v575_v45  }
 0x109   : > { %1680 = vmatprep.subr.mxu0 %v736_v49  ;;  %1727 = vmatmul.mubr.msk.bf16.gmra.mxu1 %vm1081_vm1, %v1825_v61 }
 0x10a   : > { %1681 = vmatpush3.msra.mxu0 %v736_v49  ;;  %1730 = vmatprep.mubr.msk.bf16.mxu1 %vm1081_vm1, %v1826_v62 }
 0x10b   : > { %1682 = vmatprep.subr.mxu0 %v735_v50 }
 0x10c   : > { %657 = vperm.xlu1 %1819, %v578_v47   ;;  %652 = vperm.xlu0 %1818, %v577_v48  }
 0x10d   : > { %1683 = vmatpush3.msra.mxu0 %v735_v50 }
 0x10e   : > { %1684 = vmatprep.subr.mxu0 %v734_v51 }
 0x10f   : > { %1685 = vmatpush3.msra.mxu0 %v734_v51 }
 0x110   : > { %1686 = vmatprep.subr.mxu0 %v733_v52 }
 0x111   : > { %1687 = vmatpush3.msra.mxu0 %v733_v52  ;;  %1731 = vmatmul.mubr.msk.bf16.gmra.mxu1 %vm1081_vm1, %v1827_v63 }
 0x112   : > { %1688 = vmatprep.subr.mxu0 %v732_v55  ;;  %1734 = vmatprep.mubr.msk.bf16.mxu1 %vm1081_vm1, %v1828_v0 }
 0x113   : > { %1689 = vmatpush3.msra.mxu0 %v732_v55 }
 0x114   : > { %1690 = vmatprep.subr.mxu0 %v731_v57 }
 0x115   : > { %1691 = vmatpush3.msra.mxu0 %v731_v57 }
 0x116   : > { %1692 = vmatprep.subr.mxu0 %v730_v58 }
 0x117   : > { %1693 = vmatpush3.msra.mxu0 %v730_v58 }
 0x119   : > { %1735 = vmatmul.mubr.msk.bf16.gmra.mxu1 %vm1081_vm1, %v1829_v1 }
 0x16b   : > { %v593_v3 = vpop.permute.xlu1 %592  ;;  %v583_v4 = vpop.permute.xlu0 %582 }
 0x16c   : > { %v666_v5 = vmul.f32 %v2149_v2, %v583_v4  ;;  %v668_v6 = vmul.f32 %v2149_v2, %v593_v3  ;;  %v1830_v4 = vld [vmem:[%s2042_s19] sm:$0xff]  }
 0x16d   : > { %1754 = vmatprep.mubr.bf16.mxu1 %v1830_v4 }
 0x16e   : > { %vm682_vm2 = vcmp.gt.f32.partialorder %v666_v5, 0.0  ;;  %v698_v7 = vmul.f32 0.2, %v666_v5  ;;  %v700_v13 = vmul.f32 0.2, %v668_v6  ;;  %vm684_vm4 = vcmp.gt.f32.partialorder %v668_v6, 0.0 }
 0x16f   : > { %v598_v8 = vpop.permute.xlu1 %597  ;;  %v588_v9 = vpop.permute.xlu0 %587 }
 0x170   : > { %v669_v10 = vmul.f32 %v2149_v2, %v598_v8  ;;  %v667_v11 = vmul.f32 %v2149_v2, %v588_v9  ;;  %v714_v12 = vsel %vm682_vm2, %v666_v5, %v698_v7  ;;  %v716_v21 = vsel %vm684_vm4, %v668_v6, %v700_v13  ;;  %v1832_v5 = vld [vmem:[%s2042_s19] sm:$0xff]  }
 0x171   : > { %1694 = vmatprep.mubr.f32.mxu0 %v714_v12 }
 0x172   : > { %v699_v14 = vmul.f32 0.2, %v667_v11  ;;  %vm683_vm3 = vcmp.gt.f32.partialorder %v667_v11, 0.0  ;;  %v701_v15 = vmul.f32 0.2, %v669_v10  ;;  %vm685_vm5 = vcmp.gt.f32.partialorder %v669_v10, 0.0 }
 0x173   : > { %v608_v16 = vpop.permute.xlu1 %607  ;;  %v603_v17 = vpop.permute.xlu0 %602 }
 0x174   : > { %v671_v18 = vmul.f32 %v2149_v2, %v608_v16  ;;  %v670_v19 = vmul.f32 %v2149_v2, %v603_v17  ;;  %v715_v20 = vsel %vm683_vm3, %v667_v11, %v699_v14  ;;  %v717_v26 = vsel %vm685_vm5, %v669_v10, %v701_v15  ;;  %v1537_v16 = vld [vmem:[%s2307_s5] ss:$0 sm:$0xff] }
 0x175   : > { %1695 = vmatmul.mubr.f32.vlgmr.msra.gmra.mxu0 %v715_v20 }
 0x176   : > { %v702_v22 = vmul.f32 0.2, %v670_v19  ;;  %1697 = vmatprep.mubr.f32.mxu0 %v716_v21  ;;  %vm686_vm6 = vcmp.gt.f32.partialorder %v670_v19, 0.0  ;;  %v703_v23 = vmul.f32 0.2, %v671_v18  ;;  %vm687_vm7 = vcmp.gt.f32.partialorder %v671_v18, 0.0 }
 0x177   : > { %v618_v24 = vpop.permute.xlu1 %617  ;;  %v613_v25 = vpop.permute.xlu0 %612 }
 0x178   : > { %v673_v27 = vmul.f32 %v2149_v2, %v618_v24  ;;  %v672_v28 = vmul.f32 %v2149_v2, %v613_v25  ;;  %v718_v29 = vsel %vm686_vm6, %v670_v19, %v702_v22  ;;  %v719_v34 = vsel %vm687_vm7, %v671_v18, %v703_v23 }
 0x179   : > { %1698 = vmatmul.mubr.f32.gmra.mxu0 %v717_v26 }
 0x17a   : > { %v704_v30 = vmul.f32 0.2, %v672_v28  ;;  %1700 = vmatprep.mubr.f32.mxu0 %v718_v29  ;;  %vm688_vm8 = vcmp.gt.f32.partialorder %v672_v28, 0.0  ;;  %v705_v31 = vmul.f32 0.2, %v673_v27  ;;  %vm689_vm9 = vcmp.gt.f32.partialorder %v673_v27, 0.0 }
 0x17b   : > { %v628_v32 = vpop.permute.xlu1 %627  ;;  %v623_v33 = vpop.permute.xlu0 %622 }
 0x17c   : > { %v675_v35 = vmul.f32 %v2149_v2, %v628_v32  ;;  %v674_v36 = vmul.f32 %v2149_v2, %v623_v33  ;;  %v720_v37 = vsel %vm688_vm8, %v672_v28, %v704_v30  ;;  %v721_v42 = vsel %vm689_vm9, %v673_v27, %v705_v31 }
 0x17d   : > { %1701 = vmatmul.mubr.f32.gmra.mxu0 %v719_v34 }
 0x17e   : > { %v706_v38 = vmul.f32 0.2, %v674_v36  ;;  %1703 = vmatprep.mubr.f32.mxu0 %v720_v37  ;;  %vm690_vm10 = vcmp.gt.f32.partialorder %v674_v36, 0.0  ;;  %v707_v39 = vmul.f32 0.2, %v675_v35  ;;  %vm691_vm11 = vcmp.gt.f32.partialorder %v675_v35, 0.0 }
 0x17f   : > { %v638_v40 = vpop.permute.xlu1 %637  ;;  %v633_v41 = vpop.permute.xlu0 %632 }
 0x180   : > { %v677_v43 = vmul.f32 %v2149_v2, %v638_v40  ;;  %v676_v44 = vmul.f32 %v2149_v2, %v633_v41  ;;  %v722_v45 = vsel %vm690_vm10, %v674_v36, %v706_v38  ;;  %v723_v50 = vsel %vm691_vm11, %v675_v35, %v707_v39 }
 0x181   : > { %1704 = vmatmul.mubr.f32.gmra.mxu0 %v721_v42 }
 0x182   : > { %v708_v46 = vmul.f32 0.2, %v676_v44  ;;  %1706 = vmatprep.mubr.f32.mxu0 %v722_v45  ;;  %vm692_vm12 = vcmp.gt.f32.partialorder %v676_v44, 0.0  ;;  %v709_v47 = vmul.f32 0.2, %v677_v43  ;;  %vm693_vm13 = vcmp.gt.f32.partialorder %v677_v43, 0.0 }
 0x183   : > { %v648_v48 = vpop.permute.xlu1 %647  ;;  %v643_v49 = vpop.permute.xlu0 %642 }
 0x184   : > { %v679_v51 = vmul.f32 %v2149_v2, %v648_v48  ;;  %v678_v52 = vmul.f32 %v2149_v2, %v643_v49  ;;  %v724_v53 = vsel %vm692_vm12, %v676_v44, %v708_v46  ;;  %v725_v57 = vsel %vm693_vm13, %v677_v43, %v709_v47 }
 0x185   : > { %1707 = vmatmul.mubr.f32.gmra.mxu0 %v723_v50 }
 0x186   : > { %v710_v54 = vmul.f32 0.2, %v678_v52  ;;  %1709 = vmatprep.mubr.f32.mxu0 %v724_v53  ;;  %vm694_vm14 = vcmp.gt.f32.partialorder %v678_v52, 0.0  ;;  %v711_v58 = vmul.f32 0.2, %v679_v51  ;;  %vm695_vm15 = vcmp.gt.f32.partialorder %v679_v51, 0.0 }
 0x187   : > { %v658_v55 = vpop.permute.xlu1 %657  ;;  %v653_v56 = vpop.permute.xlu0 %652 }
 0x188   : > { %v681_v59 = vmul.f32 %v2149_v2, %v658_v55  ;;  %v680_v60 = vmul.f32 %v2149_v2, %v653_v56  ;;  %v726_v61 = vsel %vm694_vm14, %v678_v52, %v710_v54  ;;  %v727_v0 = vsel %vm695_vm15, %v679_v51, %v711_v58 }
 0x189   : > { %1710 = vmatmul.mubr.f32.gmra.mxu0 %v725_v57 }
 0x18a   : > { %v712_v62 = vmul.f32 0.2, %v680_v60  ;;  %1712 = vmatprep.mubr.f32.mxu0 %v726_v61  ;;  %vm696_vm0 = vcmp.gt.f32.partialorder %v680_v60, 0.0  ;;  %v713_v63 = vmul.f32 0.2, %v681_v59  ;;  %vm697_vm1 = vcmp.gt.f32.partialorder %v681_v59, 0.0 }
 0x18c   : > { %v728_v1 = vsel %vm696_vm0, %v680_v60, %v712_v62  ;;  %v729_v3 = vsel %vm697_vm1, %v681_v59, %v713_v63  ;;  %v929_v59 = vlaneseq }
 0x18d   : > { %1713 = vmatmul.mubr.f32.gmra.mxu0 %v727_v0 }
 0x18e   : > { %1715 = vmatprep.mubr.f32.mxu0 %v728_v1  ;;  %v930_v63 = vshrl.u32 %v929_v59, 7 }
 0x191   : > { %1716 = vmatmul.mubr.f32.gmra.mxu0 %v729_v3  ;;  %v898_v3 = vld [vmem:[#allocation5] sm:$0x1] }
 0x192   : > { %1774 = vmatprep.mubr.bf16.mxu0 %v1832_v5  ;;  %v931_v5 = vsub.s32 0, %v930_v63 }
 0x1c1   : > { %v2191_v34 = vpop.f32.mrf.mxu1 }
 0x1c3   : > { %v2201_v48 = vpop.f32.mrf.mxu1 }
 0x1c5   : > { %v2203_v54 = vpop.f32.mrf.mxu1 }
 0x1c7   : > { %v1143_v57 = vpop.f32.mrf.mxu1 }
 0x1c9   : > { %v2205_v61 = vpop.f32.mrf.mxu1 }
 0x1cb   : > { %v2207_v1 = vpop.f32.mrf.mxu1 }
 0x235   : > { %v1696_v2 = vpop.f32.mrf.mxu0 }
 0x236   : > { %v825_v25 = vadd.f32 %v1696_v2, %v1537_v16 }
 0x237   : > { %v819_v6 = vpop.f32.mrf.mxu0 }
 0x238   : > { %v820_v22 = vadd.f32 %v1537_v16, %v819_v6  ;;  %v2209_v6 = vpop.f32.mrf.mxu1 }
 0x239   : > { %v1699_v7 = vpop.f32.mrf.mxu0 }
 0x23a   : > { %v2182_v26 = vadd.f32 %v1699_v7, %v1537_v16 }
 0x23b   : > { %v829_v8 = vpop.f32.mrf.mxu0 }
 0x23c   : > { %v2184_v27 = vadd.f32 %v1537_v16, %v829_v8 }
 0x23d   : > { %v1702_v9 = vpop.f32.mrf.mxu0 }
 0x23e   : > { %v2174_v19 = vadd.f32 %v1702_v9, %v1537_v16 }
 0x23f   : > { %v839_v10 = vpop.f32.mrf.mxu0 }
 0x240   : > { %v2172_v18 = vadd.f32 %v1537_v16, %v839_v10  ;;  %v900_v35 = vmax.f32 %v825_v25, %v2174_v19 }
 0x241   : > { %v1705_v11 = vpop.f32.mrf.mxu0 }
 0x242   : > { %v2176_v20 = vadd.f32 %v1705_v11, %v1537_v16  ;;  %v899_v30 = vmax.f32 %v820_v22, %v2172_v18  ;;  %v2214_v11 = vpop.f32.mrf.mxu1 }
 0x243   : > { %v849_v12 = vpop.f32.mrf.mxu0 }
 0x244   : > { %v2178_v23 = vadd.f32 %v1537_v16, %v849_v12  ;;  %v902_v36 = vmax.f32 %v2182_v26, %v2176_v20 }
 0x245   : > { %v1708_v13 = vpop.f32.mrf.mxu0 }
 0x246   : > { %v2186_v28 = vadd.f32 %v1708_v13, %v1537_v16  ;;  %v901_v38 = vmax.f32 %v2184_v27, %v2178_v23 }
 0x247   : > { %v859_v14 = vpop.f32.mrf.mxu0 }
 0x248   : > { %v2180_v24 = vadd.f32 %v1537_v16, %v859_v14  ;;  %v904_v42 = vmax.f32 %v900_v35, %v2186_v28 }
 0x249   : > { %v1711_v15 = vpop.f32.mrf.mxu0 }
 0x24a   : > { %v2189_v31 = vadd.f32 %v1711_v15, %v1537_v16  ;;  %v903_v39 = vmax.f32 %v899_v30, %v2180_v24  ;;  %v2217_v15 = vpop.f32.mrf.mxu1 }
 0x24b   : > { %v869_v17 = vpop.f32.mrf.mxu0 }
 0x24c   : > { %v870_v32 = vadd.f32 %v1537_v16, %v869_v17  ;;  %v906_v44 = vmax.f32 %v902_v36, %v2189_v31 }
 0x24d   : > { %v1714_v21 = vpop.f32.mrf.mxu0 }
 0x24e   : > { %v885_v40 = vadd.f32 %v1714_v21, %v1537_v16  ;;  %v905_v45 = vmax.f32 %v901_v38, %v870_v32  ;;  %v2221_v21 = vpop.f32.mrf.mxu1 }
 0x24f   : > { %v879_v29 = vpop.f32.mrf.mxu0 }
 0x250   : > { %v880_v33 = vadd.f32 %v1537_v16, %v879_v29  ;;  %v908_v49 = vmax.f32 %v904_v42, %v885_v40 }
 0x251   : > { %v1717_v37 = vpop.f32.mrf.mxu0 }
 0x252   : > { %v895_v41 = vadd.f32 %v1717_v37, %v1537_v16  ;;  %v907_v46 = vmax.f32 %v903_v39, %v880_v33  ;;  %v2228_v37 = vpop.f32.mrf.mxu1 }
 0x253   : > { %v889_v43 = vpop.f32.mrf.mxu0 }
 0x254   : > { %v890_v47 = vadd.f32 %v1537_v16, %v889_v43  ;;  %v910_v50 = vmax.f32 %v906_v44, %v895_v41  ;;  %v911_v52 = vmax.f32 %v907_v46, %v908_v49  ;;  %v2236_v44 = vpop.f32.mrf.mxu1 }
 0x256   : > { %v909_v51 = vmax.f32 %v905_v45, %v890_v47 }
 0x258   : > { %v912_v53 = vmax.f32 %v909_v51, %v910_v50  ;;  %v1736_v50 = vpop.f32.mrf.mxu1 }
 0x25a   : > { %v913_v55 = vmax.f32 %v911_v52, %v912_v53 }
 0x25c   : > { %v914_v56 = vrot.slane %v913_v55, 4 }
 0x25e   : > { %v915_v58 = vmax.f32 %v913_v55, %v914_v56 }
 0x260   : > { %v916_v60 = vrot.slane %v915_v58, 2 }
 0x262   : > { %v917_v62 = vmax.f32 %v915_v58, %v916_v60 }
 0x264   : > { %v918_v0 = vrot.slane %v917_v62, 1 }
 0x266   : > { %v919_v4 = vmax.f32 %v917_v62, %v918_v0 }
 0x268   : > { %v920_v2 = vmax.f32 %v898_v3, %v919_v4 }
 0x26a   : > { %v921_v7 = vsub.f32 %v898_v3, %v920_v2  ;;  %954 = vst [vmem:[#allocation5] sm:$0x1] %v920_v2  ;;  %v2211_v8 = vrot.slane %v920_v2, %v931_v5 }
 0x26c   : > { %v922_v9 = vmul.f32 1.442695, %v921_v7  ;;  %v961_v10 = vsub.f32 %v820_v22, %v2211_v8  ;;  %v962_v12 = vsub.f32 %v825_v25, %v2211_v8  ;;  %v975_v16 = vsub.f32 %v890_v47, %v2211_v8 }
 0x26d   : > { %v971_v17 = vsub.f32 %v870_v32, %v2211_v8  ;;  %v973_v29 = vsub.f32 %v880_v33, %v2211_v8  ;;  %v976_v30 = vsub.f32 %v895_v41, %v2211_v8  ;;  %v974_v25 = vsub.f32 %v885_v40, %v2211_v8 }
 0x26e   : > { %1834 = vpow2.f32 %v922_v9  ;;  %v977_v13 = vmul.f32 1.442695, %v961_v10  ;;  %v979_v14 = vmul.f32 1.442695, %v962_v12  ;;  %v1005_v22 = vmul.f32 1.442695, %v975_v16 }
 0x26f   : > { %v997_v35 = vmul.f32 1.442695, %v971_v17  ;;  %v972_v36 = vsub.f32 %v2189_v31, %v2211_v8  ;;  %v1001_v38 = vmul.f32 1.442695, %v973_v29  ;;  %v1007_v39 = vmul.f32 1.442695, %v976_v30 }
 0x270   : > { %1836 = vpow2.f32 %v977_v13  ;;  %v969_v32 = vsub.f32 %v2180_v24, %v2211_v8  ;;  %v1003_v43 = vmul.f32 1.442695, %v974_v25  ;;  %v970_v40 = vsub.f32 %v2186_v28, %v2211_v8 }
 0x271   : > { %1838 = vpow2.f32 %v979_v14  ;;  %v999_v41 = vmul.f32 1.442695, %v972_v36  ;;  %v967_v45 = vsub.f32 %v2178_v23, %v2211_v8  ;;  %v968_v47 = vsub.f32 %v2176_v20, %v2211_v8  ;;  %v1188_v20 = vpop.f32.mrf.mxu1 }
 0x272   : > { %1840 = vpow2.f32 %v1005_v22  ;;  %v993_v46 = vmul.f32 1.442695, %v969_v32  ;;  %v995_v49 = vmul.f32 1.442695, %v970_v40  ;;  %v965_v55 = vsub.f32 %v2172_v18, %v2211_v8 }
 0x273   : > { %1842 = vpow2.f32 %v997_v35  ;;  %v989_v53 = vmul.f32 1.442695, %v967_v45  ;;  %v991_v56 = vmul.f32 1.442695, %v968_v47  ;;  %v963_v59 = vsub.f32 %v2184_v27, %v2211_v8  ;;  %v1737_v62 = vpop.f32.mrf.mxu1 }
 0x274   : > { %1844 = vpow2.f32 %v1001_v38  ;;  %v985_v60 = vmul.f32 1.442695, %v965_v55  ;;  %v945_v55 = vld [vmem:[#allocation4 + $0x10] sm:$0xff] }
 0x275   : > { %1846 = vpow2.f32 %v1007_v39  ;;  %v1191_v27 = vpop.f32.mrf.mxu1 }
 0x276   : > { %1848 = vpow2.f32 %v1003_v43 }
 0x277   : > { %1850 = vpow2.f32 %v999_v41 }
 0x278   : > { %1852 = vpow2.f32 %v993_v46 }
 0x279   : > { %1854 = vpow2.f32 %v995_v49 }
 0x27a   : > { %1856 = vpow2.f32 %v989_v53 }
 0x27b   : > { %v1835_v42 = vpop.eup %1834  ;;  %1858 = vpow2.f32 %v991_v56  ;;  %v924_v56 = vld [vmem:[#allocation3 + $0x10] sm:$0xff] }
 0x27c   : > { %v2232_v33 = vrot.slane %v1835_v42, %v931_v5  ;;  %v981_v5 = vmul.f32 1.442695, %v963_v59  ;;  %1860 = vpow2.f32 %v985_v60  ;;  %v927_v60 = vld [vmem:[#allocation3 + $0x8] sm:$0xff] }
 0x27d   : > { %v1837_v31 = vpop.eup %1836 }
 0x27e   : > { %v1296_v24 = vmul.f32 %v1837_v31, %v2201_v48  ;;  %v1839_v51 = vpop.eup %1838  ;;  %v966_v48 = vsub.f32 %v2174_v19, %v2211_v8 }
 0x27f   : > { %v1297_v28 = vmul.f32 %v1839_v51, %v1143_v57  ;;  %v2243_v52 = vpack.c.bf16 %v1839_v51, %v1837_v31  ;;  %v1841_v58 = vpop.eup %1840  ;;  %v964_v57 = vsub.f32 %v2182_v26, %v2211_v8  ;;  %v926_v51 = vld [vmem:[#allocation3 + $0x18] sm:$0xff] }
 0x280   : > { %v987_v18 = vmul.f32 1.442695, %v966_v48  ;;  %v1843_v63 = vpop.eup %1842  ;;  %v1310_v3 = vmul.f32 %v1841_v58, %v1736_v50  ;;  %v942_v50 = vld [vmem:[#allocation4] sm:$0xff] }
 0x281   : > { %v2247_v23 = vpack.c.bf16 %v1297_v28, %v1296_v24  ;;  %v1845_v0 = vpop.eup %1844  ;;  %v983_v19 = vmul.f32 1.442695, %v964_v57  ;;  %v1306_v16 = vmul.f32 %v1843_v63, %v2217_v15  ;;  %v943_v57 = vld [vmem:[#allocation4 + $0x18] sm:$0xff] }
 0x282   : > { %v1847_v4 = vpop.eup %1846  ;;  %1862 = vpow2.f32 %v987_v18  ;;  %v1308_v7 = vmul.f32 %v1845_v0, %v1188_v20  ;;  %v946_v20 = vmul.f32 %v942_v50, %v2232_v33 }
 0x283   : > { %v1849_v2 = vpop.eup %1848  ;;  %v1311_v9 = vmul.f32 %v1847_v4, %v1737_v62  ;;  %v1218_v10 = vpack.c.bf16 %v1847_v4, %v1841_v58  ;;  %1864 = vpow2.f32 %v981_v5  ;;  %v936_v58 = vmul.f32 %v2232_v33, %v926_v51  ;;  %v925_v4 = vld [vmem:[#allocation3] sm:$0xff] }
 0x284   : > { %v1851_v12 = vpop.eup %1850  ;;  %v1309_v26 = vmul.f32 %v1849_v2, %v1191_v27  ;;  %v1217_v13 = vpack.c.bf16 %v1849_v2, %v1845_v0  ;;  %1866 = vpow2.f32 %v983_v19  ;;  %v949_v62 = vmul.f32 %v945_v55, %v2232_v33 }
 0x285   : > { %v1319_v8 = vpack.c.bf16 %v1311_v9, %v1310_v3  ;;  %1738 = vmatprep.subr.bf16.mxu1 %v1218_v10  ;;  %v1853_v14 = vpop.eup %1852  ;;  %v1307_v17 = vmul.f32 %v1851_v12, %v2228_v37  ;;  %v1216_v30 = vpack.c.bf16 %v1851_v12, %v1843_v63  ;;  %v934_v63 = vmul.f32 %v2232_v33, %v924_v56 }
 0x286   : > { %1739 = vmatpush3.bf16.msra.mxu1 %v1218_v10  ;;  %v1318_v29 = vpack.c.bf16 %v1309_v26, %v1308_v7  ;;  %v1855_v22 = vpop.eup %1854  ;;  %v1304_v35 = vmul.f32 %v1853_v14, %v2221_v21  ;;  %v947_v2 = vmul.f32 %v943_v57, %v2232_v33  ;;  %v937_v7 = vmul.f32 %v2232_v33, %v927_v60 }
 0x287   : > { %1740 = vmatprep.subr.bf16.mxu1 %v1217_v13  ;;  %1758 = vmatprep.subr.bf16.mxu0 %v1319_v8  ;;  %v1857_v25 = vpop.eup %1856  ;;  %v1317_v36 = vpack.c.bf16 %v1307_v17, %v1306_v16  ;;  %v1305_v38 = vmul.f32 %v1855_v22, %v2236_v44  ;;  %v1215_v15 = vpack.c.bf16 %v1855_v22, %v1853_v14 }
 0x288   : > { %1759 = vmatpush3.bf16.msra.mxu0 %v1319_v8  ;;  %v1859_v39 = vpop.eup %1858  ;;  %v1302_v42 = vmul.f32 %v1857_v25, %v2205_v61  ;;  %v935_v26 = vmul.f32 %v2232_v33, %v925_v4 }
 0x289   : > { %1760 = vmatprep.subr.bf16.mxu0 %v1318_v29  ;;  %v1861_v37 = vpop.eup %1860  ;;  %v1303_v32 = vmul.f32 %v1859_v39, %v2209_v6  ;;  %v1316_v43 = vpack.c.bf16 %v1305_v38, %v1304_v35  ;;  %v1214_v21 = vpack.c.bf16 %v1859_v39, %v1857_v25 }
 0x28a   : > { %1741 = vmatpush3.bf16.msra.mxu1 %v1217_v13  ;;  %v1300_v44 = vmul.f32 %v1861_v37, %v2207_v1 }
 0x28b   : > { %1742 = vmatprep.subr.bf16.mxu1 %v1216_v30  ;;  %v1315_v31 = vpack.c.bf16 %v1303_v32, %v1302_v42 }
 0x28c   : > { %1761 = vmatpush3.bf16.msra.mxu0 %v1318_v29 }
 0x28d   : > { %1762 = vmatprep.subr.bf16.mxu0 %v1317_v36 }
 0x28e   : > { %1743 = vmatpush3.bf16.msra.mxu1 %v1216_v30 }
 0x28f   : > { %1744 = vmatprep.subr.bf16.mxu1 %v1215_v15  ;;  %v1863_v41 = vpop.eup %1862 }
 0x290   : > { %1763 = vmatpush3.bf16.msra.mxu0 %v1317_v36  ;;  %v1865_v40 = vpop.eup %1864  ;;  %v1301_v45 = vmul.f32 %v1863_v41, %v2214_v11  ;;  %v1213_v61 = vpack.c.bf16 %v1863_v41, %v1861_v37  ;;  %v944_v11 = vld [vmem:[#allocation4 + $0x8] sm:$0xff] }
 0x291   : > { %1764 = vmatprep.subr.bf16.mxu0 %v1316_v43  ;;  %v1867_v46 = vpop.eup %1866  ;;  %v1298_v6 = vmul.f32 %v1865_v40, %v2191_v34  ;;  %v1831_v34 = vld [vmem:[%s2042_s19 + $0x8] sm:$0xff]   ;;  %v948_v28 = vmul.f32 %v944_v11, %v2232_v33 }
 0x292   : > { %1745 = vmatpush3.bf16.msra.mxu1 %v1215_v15  ;;  %v1299_v24 = vmul.f32 %v1867_v46, %v2203_v54  ;;  %v1314_v47 = vpack.c.bf16 %v1301_v45, %v1300_v44  ;;  %v1212_v1 = vpack.c.bf16 %v1867_v46, %v1865_v40  ;;  %v1833_v54 = vld [vmem:[%s2042_s19 + $0x8] sm:$0xff]  }
 0x293   : > { %1746 = vmatprep.subr.bf16.mxu1 %v1214_v21 }
 0x294   : > { %1765 = vmatpush3.bf16.msra.mxu0 %v1316_v43  ;;  %v1313_v49 = vpack.c.bf16 %v1299_v24, %v1298_v6 }
 0x295   : > { %1766 = vmatprep.subr.bf16.mxu0 %v1315_v31 }
 0x296   : > { %1747 = vmatpush3.bf16.msra.mxu1 %v1214_v21 }
 0x297   : > { %1748 = vmatprep.subr.bf16.mxu1 %v1213_v61 }
 0x298   : > { %1767 = vmatpush3.bf16.msra.mxu0 %v1315_v31 }
 0x299   : > { %1768 = vmatprep.subr.bf16.mxu0 %v1314_v47 }
 0x29a   : > { %1749 = vmatpush3.bf16.msra.mxu1 %v1213_v61 }
 0x29b   : > { %1750 = vmatprep.subr.bf16.mxu1 %v1212_v1 }
 0x29c   : > { %1769 = vmatpush3.bf16.msra.mxu0 %v1314_v47 }
 0x29d   : > { %1770 = vmatprep.subr.bf16.mxu0 %v1313_v49 }
 0x29e   : > { %1751 = vmatpush3.bf16.msra.mxu1 %v1212_v1 }
 0x29f   : > { %1752 = vmatprep.subr.bf16.mxu1 %v2243_v52 }
 0x2a0   : > { %1771 = vmatpush3.bf16.msra.mxu0 %v1313_v49 }
 0x2a1   : > { %1772 = vmatprep.subr.bf16.mxu0 %v2247_v23 }
 0x2a2   : > { %1753 = vmatpush3.bf16.msra.mxu1 %v2243_v52 }
 0x2a4   : > { %1773 = vmatpush3.bf16.msra.mxu0 %v2247_v23 }
 0x2a5   : > { %1755 = vmatmul.mubr.bf16.vlgmr.msra.gmra.mxu1 %v1831_v34 }
 0x2a7   : > { %1775 = vmatmul.mubr.bf16.vlgmr.msra.gmra.mxu0 %v1833_v54 }
 0x365   : > { %v1756_v53 = vpop.f32.mrf.mxu1 }
 0x366   : > { %v1282_v48 = vadd.f32 %v1756_v53, %v948_v28 }
 0x367   : > { %v1265_v59 = vpop.f32.mrf.mxu1  ;;  %v1776_v52 = vpop.f32.mrf.mxu0 }
 0x368   : > { %1286 = vst [vmem:[#allocation4 + $0x8] sm:$0xff] %v1282_v48  ;;  %v1280_v23 = vadd.f32 %v1265_v59, %v946_v20  ;;  %v1383_v18 = vadd.f32 %v1776_v52, %v936_v58 }
 0x369   : > { %v1757_v0 = vpop.f32.mrf.mxu1  ;;  %v1366_v3 = vpop.f32.mrf.mxu0 }
 0x36a   : > { %1284 = vst [vmem:[#allocation4] sm:$0xff] %v1280_v23  ;;  %1387 = vst [vmem:[#allocation3 + $0x18] sm:$0xff] %v1383_v18  ;;  %v1283_v5 = vadd.f32 %v1757_v0, %v949_v62  ;;  %v1381_v19 = vadd.f32 %v1366_v3, %v934_v63 }
 0x36b   : > { %v1268_v9 = vpop.f32.mrf.mxu1  ;;  %v1777_v27 = vpop.f32.mrf.mxu0 }
 0x36c   : > { %1287 = vst [vmem:[#allocation4 + $0x10] sm:$0xff] %v1283_v5  ;;  %1385 = vst [vmem:[#allocation3 + $0x10] sm:$0xff] %v1381_v19  ;;  %v1281_v10 = vadd.f32 %v1268_v9, %v947_v2  ;;  %v1384_v12 = vadd.f32 %v1777_v27, %v937_v7  ;;  %1392 = sbr.rel (%p1560_p10) target bundleno = 926 (0x39e), region = 105 }
 0x36d   : > { %v1369_v8 = vpop.f32.mrf.mxu0 }
 0x36e   : > { %1285 = vst [vmem:[#allocation4 + $0x18] sm:$0xff] %v1281_v10  ;;  %1388 = vst [vmem:[#allocation3 + $0x8] sm:$0xff] %v1384_v12  ;;  %v1382_v13 = vadd.f32 %v1369_v8, %v935_v26 }
 0x370   : > { %1386 = vst [vmem:[#allocation3] sm:$0xff] %v1382_v13 }
 0x371   : > { %v1393_v14 = vld [vmem:[#allocation4] sm:$0xff]  ;;  %v1395_v22 = vld [vmem:[#allocation4 + $0x8] sm:$0xff]  ;;  %v1407_v39 = vld [vmem:[#allocation3 + $0x18] sm:$0xff] }
 0x372   : > { %v1397_v17 = vadd.f32 1e-30, %v1393_v14  ;;  %v1399_v30 = vadd.f32 1e-30, %v1395_v22 }
 0x373   : > { %v1396_v25 = vld [vmem:[#allocation4 + $0x10] sm:$0xff] }
 0x374   : > { %1868 = vrcp.f32 %v1397_v17  ;;  %v1400_v35 = vadd.f32 1e-30, %v1396_v25  ;;  %v1405_v33 = vld [vmem:[#allocation3 + $0x10] sm:$0xff] }
 0x375   : > { %v1394_v16 = vld [vmem:[#allocation4 + $0x18] sm:$0xff]  ;;  %v1408_v42 = vld [vmem:[#allocation3 + $0x8] sm:$0xff] }
 0x376   : > { %v1398_v29 = vadd.f32 1e-30, %v1394_v16 }
 0x377   : > { %v1406_v36 = vld [vmem:[#allocation3] sm:$0xff] }
 0x378   : > { %1870 = vrcp.f32 %v1398_v29 }
 0x379   : > { %1872 = vrcp.f32 %v1399_v30 }
 0x37a   : > { %1874 = vrcp.f32 %v1400_v35 }
 0x381   : > { %v1869_v38 = vpop.eup %1868 }
 0x382   : > { %v1409_v37 = vmul.f32 %v1869_v38, %v1405_v33 }
 0x384   : > { %v1417_v21 = vmul.f32 1.442695, %v1409_v37  ;;  %vm1413_vm2 = vcmp.gt.f32.partialorder %v1409_v37, 0.0 }
 0x385   : > { %v1871_v15 = vpop.eup %1870 }
 0x386   : > { %v1873_v32 = vpop.eup %1872  ;;  %v1410_v43 = vmul.f32 %v1871_v15, %v1406_v36  ;;  %1876 = vpow2.f32 %v1417_v21 }
 0x387   : > { %v1875_v41 = vpop.eup %1874  ;;  %v1411_v40 = vmul.f32 %v1873_v32, %v1407_v39 }
 0x388   : > { %v1419_v44 = vmul.f32 1.442695, %v1410_v43  ;;  %v1412_v31 = vmul.f32 %v1875_v41, %v1408_v42  ;;  %vm1414_vm3 = vcmp.gt.f32.partialorder %v1410_v43, 0.0 }
 0x389   : > { %v1421_v45 = vmul.f32 1.442695, %v1411_v40  ;;  %vm1415_vm4 = vcmp.gt.f32.partialorder %v1411_v40, 0.0 }
 0x38a   : > { %1878 = vpow2.f32 %v1419_v44  ;;  %v1423_v46 = vmul.f32 1.442695, %v1412_v31  ;;  %vm1416_vm5 = vcmp.gt.f32.partialorder %v1412_v31, 0.0 }
 0x38b   : > { %1880 = vpow2.f32 %v1421_v45 }
 0x38c   : > { %1882 = vpow2.f32 %v1423_v46 }
 0x393   : > { %v1877_v61 = vpop.eup %1876 }
 0x394   : > { %v1561_v24 = vadd.f32 -1.0, %v1877_v61 }
 0x396   : > { %v1429_v34 = vsel %vm1413_vm2, %v1409_v37, %v1561_v24 }
 0x397   : > { %v1879_v6 = vpop.eup %1878  ;;  %1433 = vst [vmem:[#allocation7] sm:$0xff] %v1429_v34 }
 0x398   : > { %v1881_v47 = vpop.eup %1880  ;;  %v1562_v1 = vadd.f32 -1.0, %v1879_v6 }
 0x399   : > { %v1883_v49 = vpop.eup %1882  ;;  %v1563_v54 = vadd.f32 -1.0, %v1881_v47 }
 0x39a   : > { %v1430_v11 = vsel %vm1414_vm3, %v1410_v43, %v1562_v1  ;;  %v1564_v50 = vadd.f32 -1.0, %v1883_v49 }
 0x39b   : > { %1434 = vst [vmem:[#allocation7 + $0x8] sm:$0xff] %v1430_v11  ;;  %v1431_v51 = vsel %vm1415_vm4, %v1411_v40, %v1563_v54 }
 0x39c   : > { %1435 = vst [vmem:[#allocation7 + $0x10] sm:$0xff] %v1431_v51  ;;  %v1432_v28 = vsel %vm1416_vm5, %v1412_v31, %v1564_v50 }
 0x39d   : > { %1436 = vst [vmem:[#allocation7 + $0x18] sm:$0xff] %v1432_v28 }
 0x39e PF: > { %p1786_p11 = scmp.eq.s32.totalorder %s2008_s12, 1  ;;  %s1939_s19 = smov [#allocation7]  }
 0x39f   : > { %s1443_s25 = sshll.u32 %s1939_s19, 4  ;;  %s1444_s25 = int_to_ptr.vmem [resolvable:$true] %s1443_s25 }
 0x3a0   : > { %s1884_s26 = scalar_lea.vmem %s1444_s25, 512  ;;  %p1891_p1 = scmp.lt.s32.totalorder %s1444_s25, %s1444_s25 }
 0x3a1   : > { %p1885_p12 = scmp.ne.s32.totalorder %s1444_s25, %s1884_s26  ;;  %p1892_p2 = scmp.lt.s32.totalorder %s1884_s26, %s1884_s26 }
 0x3a3   : > { %p1886_p13 = pnand %p1885_p12, %p1786_p11  ;;  %p1893_p3 = por %p1892_p2, %p1891_p1 }
 0x3a5   : > { %p1887_p0 = pneg %p1886_p13 }
 0x3a7   : > { %p1894_p4 = pnand %p1893_p3, %p1887_p0 }
 0x3a9   : > { %1897 = shalt.err (!%p1894_p4)
}
 0x3aa   : > { %s1940_s27 = smov 128   ;;  %s1941_s28 = smov 8  }
 0x3ab   : > { %1783 = dma.vmem_to_hbm [thread:$0]  (%p1786_p11), %s1444_s25, 512, %s2311_s9, [#allocation8], %s1940_s27, %s1940_s27, %s1941_s28  }
 0x3ac   : > { %1921 = dma.done.wait (%p1786_p11), [#allocation8], 512  }
 0x3ad   : > { %1923 = vsyncadd (%p1786_p11), [#allocation8], 4294966784 }
 0x3ae PF: > { %p17_p5 = scmp.ge.s32.totalorder %s2011_s13, 4   ;;  %s2312_s30 = smov %s1930_s10 }
 0x3af   : > { %s2313_s10 = smov %s2020_s16  ;;  %s2314_s11 = smov %s2011_s13 }
 0x3b0   :  { %19 = sbr.rel (!%p17_p5) target bundleno = 2 (0x2), region = 143 }
 0x3b5   :  { %1459 = vsyncpa [#allocation8], 1 }
 0x3b6   :  { %1461 = vsyncpa [#allocation8 + $0x1], 1 }

</bundles_post_ra>
